<compile_context>
chip_gen: v5e
topology: v5e:2x2
jax: 0.10.0
libtpu: 0.0.40
codegen_flags: <defaults>
</compile_context>

<pallas_src>
import functools

import jax
import jax.numpy as jnp
from jax.experimental import pallas as pl
from jax.experimental.pallas import tpu as pltpu

LEAKY_SLOPE = 0.01
BN_EPS = 1e-5


@functools.lru_cache(maxsize=None)
def _vmem_limit_bytes():
    """3/4 of physical VMEM, capped at 96 MiB (v7x: 48 MiB, v5e/v6e: 96 MiB)."""
    cap = 128 * 1024 * 1024
    try:
        info = pltpu.get_tpu_info()
        cap = int(getattr(info, "vmem_capacity_bytes", cap))
    except Exception:
        pass
    return int(min(96 * 1024 * 1024, (cap * 3) // 4))


# ----------------------------------------------------------------------------
# Pallas kernels
# ----------------------------------------------------------------------------
def _conv_bn_lrelu_kernel(x_ref, w_ref, scale_ref, shift_ref, o_ref):
    """y = leaky_relu((x @ w) * scale + shift)

    x_ref:     (TM, K)    bf16 im2col rows (flattened batch*spatial tile)
    w_ref:     (K, Cout)  bf16
    scale_ref: (1, Cout)  f32 folded BatchNorm scale
    shift_ref: (1, Cout)  f32 folded BatchNorm shift (includes conv bias)
    o_ref:     (TM, Cout) f32
    """
    y = jnp.dot(x_ref[...], w_ref[...], preferred_element_type=jnp.float32)
    y = y * scale_ref[...] + shift_ref[...]
    o_ref[...] = jnp.where(y >= 0.0, y, LEAKY_SLOPE * y)


def _conv_bn_lrelu_pool_kernel(x_ref, w_ref, scale_ref, shift_ref, o_ref):
    """Conv + BN + LeakyReLU with a fused 2x2 max pool.

    x_ref: (4, TM, K)  axis 0 indexes the 4 members of each 2x2 pooling window,
                       axis 1 indexes pooling windows (in (n, ho, wo) order).
    o_ref: (TM, Cout)  pooled output rows.
    """
    def branch(i):
        y = jnp.dot(x_ref[i], w_ref[...], preferred_element_type=jnp.float32)
        y = y * scale_ref[...] + shift_ref[...]
        return jnp.where(y >= 0.0, y, LEAKY_SLOPE * y)

    m = branch(0)
    for i in range(1, 4):
        m = jnp.maximum(m, branch(i))
    o_ref[...] = m


def _linear_bias_lrelu_kernel(x_ref, w_ref, b_ref, o_ref):
    """y = leaky_relu(x @ w + b).  x: (N, K) bf16, w: (K, D) bf16, b: (1, D) f32."""
    y = jnp.dot(x_ref[...], w_ref[...], preferred_element_type=jnp.float32)
    y = y + b_ref[...]
    o_ref[...] = jnp.where(y >= 0.0, y, LEAKY_SLOPE * y)


def _window_max_kernel(x_ref, o_ref):
    """Max over the leading (window-member) axis.  x: (KW, M, C) -> o: (M, C)."""
    o_ref[...] = jnp.max(x_ref[...], axis=0)


# ----------------------------------------------------------------------------
# Wrappers
# ----------------------------------------------------------------------------
def _im2col_3x3(x):
    """x: (N, H, W, C) -> (N, H, W, 9*C), same-padding 3x3 patches, (kh, kw, cin) order."""
    N, H, W, C = x.shape
    xp = jnp.pad(x, ((0, 0), (1, 1), (1, 1), (0, 0)))
    cols = [xp[:, kh:kh + H, kw:kw + W, :] for kh in range(3) for kw in range(3)]
    return jnp.concatenate(cols, axis=-1)


def _pick_tile(total, cap):
    """Largest tile <= cap that divides `total` and is a multiple of 8 (else `total`)."""
    if total <= cap:
        return total
    t = (cap // 8) * 8
    while t >= 8:
        if total % t == 0:
            return t
        t -= 8
    return total


def conv_bn_lrelu(x, w, scale, shift, *, fuse_pool2x2=False):
    """3x3 conv (pad=1) + folded-BN affine + LeakyReLU (+ optional fused MaxPool2d(2,2)).

    x: (N, H, W, Cin) f32  ->  (N, H, W, Cout) f32, or (N, H/2, W/2, Cout) if pooled.
    """
    N, H, W, Cin = x.shape
    Cout = w.shape[-1]
    K = 9 * Cin
    xcol = _im2col_3x3(x.astype(jnp.bfloat16))               # (N, H, W, K) bf16
    wm = w.reshape(K, Cout).astype(jnp.bfloat16)             # (K, Cout), (kh,kw,cin) rows
    scale2 = scale.reshape(1, Cout).astype(jnp.float32)
    shift2 = shift.reshape(1, Cout).astype(jnp.float32)
    vmem = _vmem_limit_bytes()
    flops = 2 * N * H * W * K * Cout

    if fuse_pool2x2:
        Ho, Wo = H // 2, W // 2
        nwin = N * Ho * Wo
        # (N,H,W,K) -> (4, nwin, K): axis0 = position inside the 2x2 window (dh*2+dw),
        # axis1 = windows in (n, ho, wo) row-major order.
        xq = (xcol.reshape(N, Ho, 2, Wo, 2, K)
                  .transpose(2, 4, 0, 1, 3, 5)
                  .reshape(4, nwin, K))
        tm = _pick_tile(nwin, 128)
        out = pl.pallas_call(
            _conv_bn_lrelu_pool_kernel,
            out_shape=jax.ShapeDtypeStruct((nwin, Cout), jnp.float32),
            grid=(nwin // tm,),
            in_specs=[
                pl.BlockSpec((4, tm, K), lambda m: (0, m, 0)),
                pl.BlockSpec((K, Cout), lambda m: (0, 0)),
                pl.BlockSpec((1, Cout), lambda m: (0, 0)),
                pl.BlockSpec((1, Cout), lambda m: (0, 0)),
            ],
            out_specs=pl.BlockSpec((tm, Cout), lambda m: (m, 0)),
            compiler_params=pltpu.CompilerParams(
                dimension_semantics=("parallel",), vmem_limit_bytes=vmem),
            cost_estimate=pl.CostEstimate(
                flops=flops, transcendentals=0,
                bytes_accessed=int(xq.size) * 2 + int(wm.size) * 2 + nwin * Cout * 4),
        )(xq, wm, scale2, shift2)
        return out.reshape(N, Ho, Wo, Cout)

    npix = N * H * W
    xm = xcol.reshape(npix, K)
    tm = _pick_tile(npix, 256)
    out = pl.pallas_call(
        _conv_bn_lrelu_kernel,
        out_shape=jax.ShapeDtypeStruct((npix, Cout), jnp.float32),
        grid=(npix // tm,),
        in_specs=[
            pl.BlockSpec((tm, K), lambda m: (m, 0)),
            pl.BlockSpec((K, Cout), lambda m: (0, 0)),
            pl.BlockSpec((1, Cout), lambda m: (0, 0)),
            pl.BlockSpec((1, Cout), lambda m: (0, 0)),
        ],
        out_specs=pl.BlockSpec((tm, Cout), lambda m: (m, 0)),
        compiler_params=pltpu.CompilerParams(
            dimension_semantics=("parallel",), vmem_limit_bytes=vmem),
        cost_estimate=pl.CostEstimate(
            flops=flops, transcendentals=0,
            bytes_accessed=int(xm.size) * 2 + int(wm.size) * 2 + npix * Cout * 4),
    )(xm, wm, scale2, shift2)
    return out.reshape(N, H, W, Cout)


def adaptive_max_pool_2x2(x):
    """AdaptiveMaxPool2d((2,2)) for even H, W: non-overlapping (H//2, W//2) windows.

    x: (N, H, W, C) f32 -> (N, 2, 2, C) f32.
    """
    # TODO(synk): odd H/W would need PyTorch's floor/ceil adaptive windowing.
    N, H, W, C = x.shape
    h2, w2 = H // 2, W // 2
    kw = h2 * w2
    nwin = N * 4
    # (N,H,W,C) -> (kw, nwin, C): axis0 = position inside an (h2, w2) window,
    # axis1 = windows in (n, i, j) order.
    xq = (x.reshape(N, 2, h2, 2, w2, C)
            .transpose(2, 4, 0, 1, 3, 5)
            .reshape(kw, nwin, C))
    out = pl.pallas_call(
        _window_max_kernel,
        out_shape=jax.ShapeDtypeStruct((nwin, C), jnp.float32),
        grid=(1,),
        in_specs=[pl.BlockSpec((kw, nwin, C), lambda m: (0, 0, 0))],
        out_specs=pl.BlockSpec((nwin, C), lambda m: (0, 0)),
        compiler_params=pltpu.CompilerParams(vmem_limit_bytes=_vmem_limit_bytes()),
    )(xq)
    return out.reshape(N, 2, 2, C)


def linear_lrelu(x, w, b):
    """Linear + LeakyReLU.  x: (N, K) f32, w: (K, D) f32, b: (D,) f32 -> (N, D) f32."""
    N, K = x.shape
    D = w.shape[1]
    out = pl.pallas_call(
        _linear_bias_lrelu_kernel,
        out_shape=jax.ShapeDtypeStruct((N, D), jnp.float32),
        grid=(1,),
        in_specs=[
            pl.BlockSpec((N, K), lambda m: (0, 0)),
            pl.BlockSpec((K, D), lambda m: (0, 0)),
            pl.BlockSpec((1, D), lambda m: (0, 0)),
        ],
        out_specs=pl.BlockSpec((N, D), lambda m: (0, 0)),
        compiler_params=pltpu.CompilerParams(vmem_limit_bytes=_vmem_limit_bytes()),
        cost_estimate=pl.CostEstimate(
            flops=2 * N * K * D, transcendentals=0,
            bytes_accessed=N * K * 2 + K * D * 2 + N * D * 4),
    )(x.astype(jnp.bfloat16), w.astype(jnp.bfloat16),
      b.reshape(1, D).astype(jnp.float32))
    return out


# ----------------------------------------------------------------------------
# Parameters (deterministic, synthetic init)
# ----------------------------------------------------------------------------
_CONV_CHANNELS = [(1, 64), (64, 128), (128, 256), (256, 256),
                  (256, 512), (512, 512), (512, 512), (512, 512)]
# MaxPool2d(2,2) follows conv blocks at these indices (0-based):
_POOL_AFTER = {0, 1, 3, 5}


def init_params(key, output_dim):
    convs = []
    for i, (cin, cout) in enumerate(_CONV_CHANNELS):
        k = jax.random.fold_in(key, i)
        kw_, kb_ = jax.random.split(k)
        w = jax.random.normal(kw_, (3, 3, cin, cout), jnp.float32) / jnp.sqrt(9.0 * cin)
        conv_b = 0.01 * jax.random.normal(kb_, (cout,), jnp.float32)
        # BatchNorm2d in inference mode with PyTorch default stats/affine:
        #   gamma=1, beta=0, running_mean=0, running_var=1, eps=1e-5 -> fold into affine.
        gamma = jnp.ones((cout,), jnp.float32)
        beta = jnp.zeros((cout,), jnp.float32)
        running_mean = jnp.zeros((cout,), jnp.float32)
        running_var = jnp.ones((cout,), jnp.float32)
        scale = gamma / jnp.sqrt(running_var + BN_EPS)
        shift = beta + (conv_b - running_mean) * scale
        convs.append((w, scale, shift))

    kf = jax.random.fold_in(key, 1000)
    kfw, kfb = jax.random.split(kf)
    fc_w = jax.random.normal(kfw, (2048, output_dim), jnp.float32) / jnp.sqrt(2048.0)
    fc_b = 0.01 * jax.random.normal(kfb, (output_dim,), jnp.float32)
    return {"convs": convs, "fc_w": fc_w, "fc_b": fc_b}


# ----------------------------------------------------------------------------
# Forward pass (mirrors ConvBackbone.forward)
# ----------------------------------------------------------------------------
def conv_backbone_forward(x, params):
    # x['main']: (N, H, W); torch does .unsqueeze(1) -> NCHW (N,1,H,W); here NHWC (N,H,W,1).
    h = x["main"].astype(jnp.float32)[..., None]
    for i, (w, scale, shift) in enumerate(params["convs"]):
        h = conv_bn_lrelu(h, w, scale, shift, fuse_pool2x2=(i in _POOL_AFTER))

    h = adaptive_max_pool_2x2(h)                                # (N, 2, 2, C)

    # flatten(start_dim=1) in torch is over (C, H, W) -> transpose to NCHW order first.
    N = h.shape[0]
    feat = jnp.transpose(h, (0, 3, 1, 2)).reshape(N, -1)        # (N, 2048)
    return linear_lrelu(feat, params["fc_w"], params["fc_b"])


if __name__ == "__main__":
    key = jax.random.PRNGKey(0)
    B, H, W = 2, 32, 32                 # small input; 4 maxpools -> 2x2 before adaptive pool
    output_dim = 128                    # small output_dim for the synthetic test
    x_main = jax.random.normal(jax.random.fold_in(key, 100), (B, H, W), jnp.float32)
    params = init_params(key, output_dim)
    out = conv_backbone_forward({"main": x_main}, params)
    out = jax.block_until_ready(out)
    assert out.shape == (B, output_dim)
    assert bool(jnp.all(jnp.isfinite(out)))
    print("KERNEL_OK")
</pallas_src>

<mosaic_0001>
module attributes {stable_mosaic.version = 11 : i64} {
  func.func @_conv_bn_lrelu_pool_kernel(%arg0: i32, %arg1: memref<4x128x9xbf16, #tpu.memory_space<vmem>>, %arg2: memref<9x64xbf16, #tpu.memory_space<vmem>>, %arg3: memref<1x64xf32, #tpu.memory_space<vmem>>, %arg4: memref<1x64xf32, #tpu.memory_space<vmem>>, %arg5: memref<128x64xf32, #tpu.memory_space<vmem>>) attributes {dimension_semantics = [#tpu.dimension_semantics<parallel>], iteration_bounds = array<i64: 4>, scalar_prefetch = 0 : i64, scratch_operands = 0 : i64, tpu.core_type = #tpu.core_type<tc>, window_params = [{transform_indices = @transform_0, window_bounds = array<i64: 4, 128, 9>}, {pipeline_mode = #tpu.pipeline_mode<synchronous>, transform_indices = @transform_1, window_bounds = array<i64: 9, 64>}, {pipeline_mode = #tpu.pipeline_mode<synchronous>, transform_indices = @transform_2, window_bounds = array<i64: 1, 64>}, {pipeline_mode = #tpu.pipeline_mode<synchronous>, transform_indices = @transform_3, window_bounds = array<i64: 1, 64>}, {transform_indices = @transform_4, window_bounds = array<i64: 128, 64>}]} {
    %c0 = arith.constant 0 : index
    %c0_0 = arith.constant 0 : index
    %c0_1 = arith.constant 0 : index
    %0 = vector.load %arg1[%c0, %c0_0, %c0_1] : memref<4x128x9xbf16, #tpu.memory_space<vmem>>, vector<1x128x9xbf16>
    %1 = vector.shape_cast %0 : vector<1x128x9xbf16> to vector<128x9xbf16>
    %c0_2 = arith.constant 0 : index
    %c0_3 = arith.constant 0 : index
    %2 = vector.load %arg2[%c0_2, %c0_3] : memref<9x64xbf16, #tpu.memory_space<vmem>>, vector<9x64xbf16>
    %cst = arith.constant dense<0.000000e+00> : vector<128x64xf32>
    %3 = tpu.matmul %1, %2, %cst {dimension_numbers = #tpu.dot_dimension_numbers<[1], [0], [0], [1], [0, 0, 1, 1], [], []>} : vector<128x9xbf16>, vector<9x64xbf16>, vector<128x64xf32> -> vector<128x64xf32>
    %c0_4 = arith.constant 0 : index
    %c0_5 = arith.constant 0 : index
    %4 = vector.load %arg3[%c0_4, %c0_5] : memref<1x64xf32, #tpu.memory_space<vmem>>, vector<1x64xf32>
    %5 = vector.broadcast %4 : vector<1x64xf32> to vector<128x64xf32>
    %6 = arith.mulf %3, %5 : vector<128x64xf32>
    %c0_6 = arith.constant 0 : index
    %c0_7 = arith.constant 0 : index
    %7 = vector.load %arg4[%c0_6, %c0_7] : memref<1x64xf32, #tpu.memory_space<vmem>>, vector<1x64xf32>
    %8 = vector.broadcast %7 : vector<1x64xf32> to vector<128x64xf32>
    %9 = arith.addf %6, %8 : vector<128x64xf32>
    %cst_8 = arith.constant 0.000000e+00 : f32
    %10 = vector.broadcast %cst_8 : f32 to vector<128x64xf32>
    %11 = arith.cmpf oge, %9, %10 : vector<128x64xf32>
    %cst_9 = arith.constant 0.00999999977 : f32
    %12 = vector.broadcast %cst_9 : f32 to vector<128x64xf32>
    %13 = arith.mulf %12, %9 : vector<128x64xf32>
    %14 = arith.select %11, %9, %13 : vector<128x64xi1>, vector<128x64xf32>
    %c1 = arith.constant 1 : index
    %c0_10 = arith.constant 0 : index
    %c0_11 = arith.constant 0 : index
    %15 = vector.load %arg1[%c1, %c0_10, %c0_11] : memref<4x128x9xbf16, #tpu.memory_space<vmem>>, vector<1x128x9xbf16>
    %16 = vector.shape_cast %15 : vector<1x128x9xbf16> to vector<128x9xbf16>
    %c0_12 = arith.constant 0 : index
    %c0_13 = arith.constant 0 : index
    %17 = vector.load %arg2[%c0_12, %c0_13] : memref<9x64xbf16, #tpu.memory_space<vmem>>, vector<9x64xbf16>
    %cst_14 = arith.constant dense<0.000000e+00> : vector<128x64xf32>
    %18 = tpu.matmul %16, %17, %cst_14 {dimension_numbers = #tpu.dot_dimension_numbers<[1], [0], [0], [1], [0, 0, 1, 1], [], []>} : vector<128x9xbf16>, vector<9x64xbf16>, vector<128x64xf32> -> vector<128x64xf32>
    %c0_15 = arith.constant 0 : index
    %c0_16 = arith.constant 0 : index
    %19 = vector.load %arg3[%c0_15, %c0_16] : memref<1x64xf32, #tpu.memory_space<vmem>>, vector<1x64xf32>
    %20 = vector.broadcast %19 : vector<1x64xf32> to vector<128x64xf32>
    %21 = arith.mulf %18, %20 : vector<128x64xf32>
    %c0_17 = arith.constant 0 : index
    %c0_18 = arith.constant 0 : index
    %22 = vector.load %arg4[%c0_17, %c0_18] : memref<1x64xf32, #tpu.memory_space<vmem>>, vector<1x64xf32>
    %23 = vector.broadcast %22 : vector<1x64xf32> to vector<128x64xf32>
    %24 = arith.addf %21, %23 : vector<128x64xf32>
    %cst_19 = arith.constant 0.000000e+00 : f32
    %25 = vector.broadcast %cst_19 : f32 to vector<128x64xf32>
    %26 = arith.cmpf oge, %24, %25 : vector<128x64xf32>
    %cst_20 = arith.constant 0.00999999977 : f32
    %27 = vector.broadcast %cst_20 : f32 to vector<128x64xf32>
    %28 = arith.mulf %27, %24 : vector<128x64xf32>
    %29 = arith.select %26, %24, %28 : vector<128x64xi1>, vector<128x64xf32>
    %30 = arith.maximumf %14, %29 : vector<128x64xf32>
    %c2 = arith.constant 2 : index
    %c0_21 = arith.constant 0 : index
    %c0_22 = arith.constant 0 : index
    %31 = vector.load %arg1[%c2, %c0_21, %c0_22] : memref<4x128x9xbf16, #tpu.memory_space<vmem>>, vector<1x128x9xbf16>
    %32 = vector.shape_cast %31 : vector<1x128x9xbf16> to vector<128x9xbf16>
    %c0_23 = arith.constant 0 : index
    %c0_24 = arith.constant 0 : index
    %33 = vector.load %arg2[%c0_23, %c0_24] : memref<9x64xbf16, #tpu.memory_space<vmem>>, vector<9x64xbf16>
    %cst_25 = arith.constant dense<0.000000e+00> : vector<128x64xf32>
    %34 = tpu.matmul %32, %33, %cst_25 {dimension_numbers = #tpu.dot_dimension_numbers<[1], [0], [0], [1], [0, 0, 1, 1], [], []>} : vector<128x9xbf16>, vector<9x64xbf16>, vector<128x64xf32> -> vector<128x64xf32>
    %c0_26 = arith.constant 0 : index
    %c0_27 = arith.constant 0 : index
    %35 = vector.load %arg3[%c0_26, %c0_27] : memref<1x64xf32, #tpu.memory_space<vmem>>, vector<1x64xf32>
    %36 = vector.broadcast %35 : vector<1x64xf32> to vector<128x64xf32>
    %37 = arith.mulf %34, %36 : vector<128x64xf32>
    %c0_28 = arith.constant 0 : index
    %c0_29 = arith.constant 0 : index
    %38 = vector.load %arg4[%c0_28, %c0_29] : memref<1x64xf32, #tpu.memory_space<vmem>>, vector<1x64xf32>
    %39 = vector.broadcast %38 : vector<1x64xf32> to vector<128x64xf32>
    %40 = arith.addf %37, %39 : vector<128x64xf32>
    %cst_30 = arith.constant 0.000000e+00 : f32
    %41 = vector.broadcast %cst_30 : f32 to vector<128x64xf32>
    %42 = arith.cmpf oge, %40, %41 : vector<128x64xf32>
    %cst_31 = arith.constant 0.00999999977 : f32
    %43 = vector.broadcast %cst_31 : f32 to vector<128x64xf32>
    %44 = arith.mulf %43, %40 : vector<128x64xf32>
    %45 = arith.select %42, %40, %44 : vector<128x64xi1>, vector<128x64xf32>
    %46 = arith.maximumf %30, %45 : vector<128x64xf32>
    %c3 = arith.constant 3 : index
    %c0_32 = arith.constant 0 : index
    %c0_33 = arith.constant 0 : index
    %47 = vector.load %arg1[%c3, %c0_32, %c0_33] : memref<4x128x9xbf16, #tpu.memory_space<vmem>>, vector<1x128x9xbf16>
    %48 = vector.shape_cast %47 : vector<1x128x9xbf16> to vector<128x9xbf16>
    %c0_34 = arith.constant 0 : index
    %c0_35 = arith.constant 0 : index
    %49 = vector.load %arg2[%c0_34, %c0_35] : memref<9x64xbf16, #tpu.memory_space<vmem>>, vector<9x64xbf16>
    %cst_36 = arith.constant dense<0.000000e+00> : vector<128x64xf32>
    %50 = tpu.matmul %48, %49, %cst_36 {dimension_numbers = #tpu.dot_dimension_numbers<[1], [0], [0], [1], [0, 0, 1, 1], [], []>} : vector<128x9xbf16>, vector<9x64xbf16>, vector<128x64xf32> -> vector<128x64xf32>
    %c0_37 = arith.constant 0 : index
    %c0_38 = arith.constant 0 : index
    %51 = vector.load %arg3[%c0_37, %c0_38] : memref<1x64xf32, #tpu.memory_space<vmem>>, vector<1x64xf32>
    %52 = vector.broadcast %51 : vector<1x64xf32> to vector<128x64xf32>
    %53 = arith.mulf %50, %52 : vector<128x64xf32>
    %c0_39 = arith.constant 0 : index
    %c0_40 = arith.constant 0 : index
    %54 = vector.load %arg4[%c0_39, %c0_40] : memref<1x64xf32, #tpu.memory_space<vmem>>, vector<1x64xf32>
    %55 = vector.broadcast %54 : vector<1x64xf32> to vector<128x64xf32>
    %56 = arith.addf %53, %55 : vector<128x64xf32>
    %cst_41 = arith.constant 0.000000e+00 : f32
    %57 = vector.broadcast %cst_41 : f32 to vector<128x64xf32>
    %58 = arith.cmpf oge, %56, %57 : vector<128x64xf32>
    %cst_42 = arith.constant 0.00999999977 : f32
    %59 = vector.broadcast %cst_42 : f32 to vector<128x64xf32>
    %60 = arith.mulf %59, %56 : vector<128x64xf32>
    %61 = arith.select %58, %56, %60 : vector<128x64xi1>, vector<128x64xf32>
    %62 = arith.maximumf %46, %61 : vector<128x64xf32>
    %c0_43 = arith.constant 0 : index
    %c0_44 = arith.constant 0 : index
    %63 = vector.load %arg5[%c0_43, %c0_44] : memref<128x64xf32, #tpu.memory_space<vmem>>, vector<128x64xf32>
    tpu.vector_store %arg5[%c0_43, %c0_44], %62 {strides = array<i32>} : memref<128x64xf32, #tpu.memory_space<vmem>>, vector<128x64xf32>,
    return
  }
  func.func @transform_0(%arg0: i32) -> (i32, i32, i32) {
    %c0_i32 = arith.constant 0 : i32
    %c0_i32_0 = arith.constant 0 : i32
    %c0_i32_1 = arith.constant 0 : i32
    return %c0_i32, %arg0, %c0_i32_0 : i32, i32, i32
  }
  func.func @transform_1(%arg0: i32) -> (i32, i32) {
    %c0_i32 = arith.constant 0 : i32
    %c0_i32_0 = arith.constant 0 : i32
    %c0_i32_1 = arith.constant 0 : i32
    return %c0_i32, %c0_i32_0 : i32, i32
  }
  func.func @transform_2(%arg0: i32) -> (i32, i32) {
    %c0_i32 = arith.constant 0 : i32
    %c0_i32_0 = arith.constant 0 : i32
    %c0_i32_1 = arith.constant 0 : i32
    return %c0_i32, %c0_i32_0 : i32, i32
  }
  func.func @transform_3(%arg0: i32) -> (i32, i32) {
    %c0_i32 = arith.constant 0 : i32
    %c0_i32_0 = arith.constant 0 : i32
    %c0_i32_1 = arith.constant 0 : i32
    return %c0_i32, %c0_i32_0 : i32, i32
  }
  func.func @transform_4(%arg0: i32) -> (i32, i32) {
    %c0_i32 = arith.constant 0 : i32
    %c0_i32_0 = arith.constant 0 : i32
    return %arg0, %c0_i32 : i32, i32
  }
}

</mosaic_0001>

<bundles_post_ra>
// kernel: tpu_custom_call.1
= control target key start
LH: loop header
LB: loop body
LE: loop exit
PB: predicated region body
PF: predicated region fallthrough
CT: control target
= control target key end

     0   :  { %s1822_s15 = smov 0   ;;  %s1824_s16 = smov 0   ;;  %s2186_s0 = inlined_call_operand.vmem [shape: bf16[4,512,9], index: 0, kind: input, shape index: {}]   ;;  %s2187_s1 = inlined_call_operand.vmem [shape: bf16[9,64], index: 1, kind: input, shape index: {}]   ;;  %s2188_s2 = inlined_call_operand.vmem [shape: f32[1,64], index: 2, kind: input, shape index: {}]   ;;  %s2189_s3 = inlined_call_operand.vmem [shape: f32[1,64], index: 3, kind: input, shape index: {}]   ;;  %s2190_s4 = inlined_call_operand.vmem [shape: f32[512,64], index: 4, kind: output, shape index: {}]  }
   0x1   :  { %s1826_s17 = smov 0  }
   0x2 LB: > { %s1486_s18 = sadd.s32 4294967295, %s1794_s17   ;;  %s1839_s19 = sadd.s32 1, %s1794_s17   ;;  %s1794_s17 = sphi %s1826_s17, %s2193_s17   ;;  %s1790_s16 = sphi %s1824_s16, %s2192_s16   ;;  %s1786_s15 = sphi %s1822_s15, %s2191_s15  }
   0x3   : > { %s18_s20 = ssub.s32 %s1794_s17, %s1839_s19  ;;  %s21_s21 = sadd.s32 1, %s1790_s16 }
   0x4   : > { %p19_p0 = scmp.eq.s32.totalorder %s18_s20, 0  ;;  %p28_p1 = scmp.ne.s32.totalorder %s1790_s16, %s1786_s15 }
   0x5   : > { %p29_p2 = scmp.eq.s32.totalorder %s1794_s17, 0  ;;  %p1489_p4 = scmp.ge.s32.totalorder %s1794_s17, 4 }
   0x6   : > { %s1848_s22 = scalar_select %p19_p0, %s1790_s16, %s21_s21  }
   0x7   : > { %p30_p3 = por %p29_p2, %p28_p1  ;;  %152 = sbr.rel (%p1489_p4) target bundleno = 48 (0x30), region = 28 }
   0xc   : > { %155 = sbr.rel (!%p30_p3) target bundleno = 48 (0x30), region = 32  ;;  %s157_s23 = sand.u32 (%p30_p3), 1, %s1790_s16  }
   0xd   : > { %s1711_s24 = sshll.u32 (%p30_p3), %s1794_s17, 6  ;;  %s1490_s25 = sshll.u32 (%p30_p3), %s157_s23, 8 }
   0xe   : > { %s1856_s28 = scalar_lea.vmem (%p30_p3), %s2186_s0, %s1711_s24  ;;  %s1861_s29 = scalar_lea.vmem (%p30_p3), [#allocation2], %s1490_s25 }
   0xf   : > { %v179_v0 = vld [vmem:[%s1856_s28] sm:$0xff] (%p30_p3)   ;;  %v183_v1 = vld [vmem:[%s1856_s28 + $0x8] sm:$0xff] (%p30_p3)   ;;  %v187_v2 = vld [vmem:[%s1856_s28 + $0x10] sm:$0xff] (%p30_p3)  }
  0x10   : > { %180 = vst [vmem:[%s1861_s29] sm:$0xff] (%p30_p3), %v179_v0   ;;  %v191_v3 = vld [vmem:[%s1856_s28 + $0x18] sm:$0xff] (%p30_p3)   ;;  %v195_v4 = vld [vmem:[%s1856_s28 + $0x20] sm:$0xff] (%p30_p3)   ;;  %v199_v5 = vld [vmem:[%s1856_s28 + $0x28] sm:$0xff] (%p30_p3)  }
  0x11   : > { %184 = vst [vmem:[%s1861_s29 + $0x8] sm:$0xff] %v183_v1   ;;  %v203_v6 = vld [vmem:[%s1856_s28 + $0x30] sm:$0xff]   ;;  %v207_v7 = vld [vmem:[%s1856_s28 + $0x38] sm:$0xff]   ;;  %v211_v8 = vld [vmem:[%s1856_s28 + $0x100] sm:$0xff]  }
  0x12   : > { %188 = vst [vmem:[%s1861_s29 + $0x10] sm:$0xff] %v187_v2   ;;  %v215_v9 = vld [vmem:[%s1856_s28 + $0x108] sm:$0xff]   ;;  %v219_v10 = vld [vmem:[%s1856_s28 + $0x110] sm:$0xff]   ;;  %v223_v11 = vld [vmem:[%s1856_s28 + $0x118] sm:$0xff]  }
  0x13   : > { %192 = vst [vmem:[%s1861_s29 + $0x18] sm:$0xff] %v191_v3   ;;  %v227_v12 = vld [vmem:[%s1856_s28 + $0x120] sm:$0xff]   ;;  %v231_v13 = vld [vmem:[%s1856_s28 + $0x128] sm:$0xff]   ;;  %v235_v14 = vld [vmem:[%s1856_s28 + $0x130] sm:$0xff]  }
  0x14   : > { %196 = vst [vmem:[%s1861_s29 + $0x20] sm:$0xff] %v195_v4   ;;  %v239_v15 = vld [vmem:[%s1856_s28 + $0x138] sm:$0xff]   ;;  %v243_v16 = vld [vmem:[%s1856_s28 + $0x200] sm:$0xff]   ;;  %v247_v17 = vld [vmem:[%s1856_s28 + $0x208] sm:$0xff]  }
  0x15   : > { %200 = vst [vmem:[%s1861_s29 + $0x28] sm:$0xff] %v199_v5   ;;  %v251_v18 = vld [vmem:[%s1856_s28 + $0x210] sm:$0xff]   ;;  %v255_v19 = vld [vmem:[%s1856_s28 + $0x218] sm:$0xff]   ;;  %v259_v20 = vld [vmem:[%s1856_s28 + $0x220] sm:$0xff]  }
  0x16   : > { %204 = vst [vmem:[%s1861_s29 + $0x30] sm:$0xff] %v203_v6   ;;  %v263_v21 = vld [vmem:[%s1856_s28 + $0x228] sm:$0xff]   ;;  %v267_v22 = vld [vmem:[%s1856_s28 + $0x230] sm:$0xff]   ;;  %v271_v23 = vld [vmem:[%s1856_s28 + $0x238] sm:$0xff]  }
  0x17   : > { %208 = vst [vmem:[%s1861_s29 + $0x38] sm:$0xff] %v207_v7   ;;  %v275_v24 = vld [vmem:[%s1856_s28 + $0x300] sm:$0xff]   ;;  %v279_v25 = vld [vmem:[%s1856_s28 + $0x308] sm:$0xff]   ;;  %v283_v26 = vld [vmem:[%s1856_s28 + $0x310] sm:$0xff]  }
  0x18   : > { %212 = vst [vmem:[%s1861_s29 + $0x40] sm:$0xff] %v211_v8   ;;  %v287_v27 = vld [vmem:[%s1856_s28 + $0x318] sm:$0xff]   ;;  %v291_v28 = vld [vmem:[%s1856_s28 + $0x320] sm:$0xff]   ;;  %v295_v29 = vld [vmem:[%s1856_s28 + $0x328] sm:$0xff]  }
  0x19   : > { %216 = vst [vmem:[%s1861_s29 + $0x48] sm:$0xff] %v215_v9   ;;  %v299_v30 = vld [vmem:[%s1856_s28 + $0x330] sm:$0xff]   ;;  %v303_v31 = vld [vmem:[%s1856_s28 + $0x338] sm:$0xff]  }
  0x1a   : > { %220 = vst [vmem:[%s1861_s29 + $0x50] sm:$0xff] %v219_v10  }
  0x1b   : > { %224 = vst [vmem:[%s1861_s29 + $0x58] sm:$0xff] %v223_v11  }
  0x1c   : > { %228 = vst [vmem:[%s1861_s29 + $0x60] sm:$0xff] %v227_v12  }
  0x1d   : > { %232 = vst [vmem:[%s1861_s29 + $0x68] sm:$0xff] %v231_v13  }
  0x1e   : > { %236 = vst [vmem:[%s1861_s29 + $0x70] sm:$0xff] %v235_v14  }
  0x1f   : > { %240 = vst [vmem:[%s1861_s29 + $0x78] sm:$0xff] %v239_v15  }
  0x20   : > { %244 = vst [vmem:[%s1861_s29 + $0x80] sm:$0xff] %v243_v16  }
  0x21   : > { %248 = vst [vmem:[%s1861_s29 + $0x88] sm:$0xff] %v247_v17  }
  0x22   : > { %252 = vst [vmem:[%s1861_s29 + $0x90] sm:$0xff] %v251_v18  }
  0x23   : > { %256 = vst [vmem:[%s1861_s29 + $0x98] sm:$0xff] %v255_v19  }
  0x24   : > { %260 = vst [vmem:[%s1861_s29 + $0xa0] sm:$0xff] %v259_v20  }
  0x25   : > { %264 = vst [vmem:[%s1861_s29 + $0xa8] sm:$0xff] %v263_v21  }
  0x26   : > { %268 = vst [vmem:[%s1861_s29 + $0xb0] sm:$0xff] %v267_v22  }
  0x27   : > { %272 = vst [vmem:[%s1861_s29 + $0xb8] sm:$0xff] %v271_v23  }
  0x28   : > { %276 = vst [vmem:[%s1861_s29 + $0xc0] sm:$0xff] %v275_v24  }
  0x29   : > { %280 = vst [vmem:[%s1861_s29 + $0xc8] sm:$0xff] %v279_v25  }
  0x2a   : > { %284 = vst [vmem:[%s1861_s29 + $0xd0] sm:$0xff] %v283_v26  }
  0x2b   : > { %288 = vst [vmem:[%s1861_s29 + $0xd8] sm:$0xff] %v287_v27  }
  0x2c   : > { %292 = vst [vmem:[%s1861_s29 + $0xe0] sm:$0xff] %v291_v28  }
  0x2d   : > { %296 = vst [vmem:[%s1861_s29 + $0xe8] sm:$0xff] %v295_v29  }
  0x2e   : > { %300 = vst [vmem:[%s1861_s29 + $0xf0] sm:$0xff] %v299_v30  }
  0x2f   : > { %304 = vst [vmem:[%s1861_s29 + $0xf8] sm:$0xff] %v303_v31  }
  0x30 PF: > { %p1493_p5 = scmp.ge.s32.totalorder %s1794_s17, 1  ;;  %p457_p6 = scmp.lt.s32.totalorder %s1794_s17, 5 }
  0x32   : > { %p458_p7 = pnand %p1493_p5, %p457_p6 }
  0x33   : > { %s464_s8 = sand.u32 (!%p458_p7), 1, %s1786_s15   ;;  %s1495_s15 = sshll.u32 (!%p458_p7), %s1486_s18, 4 }
  0x34   : > { %461 = sbr.rel (%p458_p7) target bundleno = 331 (0x14b), region = 73  ;;  %s1494_s9 = sshll.u32 (!%p458_p7), %s464_s8, 8 }
  0x35   : > { %s1933_s10 = scalar_lea.vmem (!%p458_p7), [#allocation2], %s1494_s9  ;;  %p491_p8 = scmp.lt.s32.totalorder (!%p458_p7), %s1495_s15, 63 }
  0x39   : > { %v1531_v32 = vld [vmem:[%s2187_s1] sm:$0xf]  ;;  %v1720_v33 = vld [vmem:[%s2187_s1] sm:$0x10]  ;;  %vm585_vm0 = vcmask 1043456   ;;  %vm586_vm1 = vcmask 1044480  }
  0x3a   : > { %v1532_v34 = vor.u32 %v1720_v33, %v1531_v32  ;;  %v1796_v35 = vmov 65535   ;;  %v1712_v39 = vld [vmem:[%s1933_s10] sm:$0xff]  ;;  %vm560_vm2 = vcmask 72704   ;;  %v1713_v43 = vld [vmem:[%s1933_s10 + $0x8] sm:$0xff]  ;;  %v1714_v47 = vld [vmem:[%s1933_s10 + $0x10] sm:$0xff]  ;;  %s2195_s15 = smov (!%p491_p8, %s1495_s15), 63 }
  0x3b   : > { %v587_v36 = vsel %vm585_vm0, 4294967295, %v1796_v35  ;;  %v1721_v40 = vld [vmem:[%s1933_s10 + $0x40] sm:$0xff]  ;;  %v1722_v44 = vld [vmem:[%s1933_s10 + $0x48] sm:$0xff]  ;;  %v1723_v48 = vld [vmem:[%s1933_s10 + $0x50] sm:$0xff]  ;;  %s1496_s17 = sshll.u32 %s2195_s15, 3  ;;  %vm1407_vm9 = vcmask 523264  }
  0x3c   : > { %v588_v37 = vsel %vm586_vm1, %v587_v36, 0  ;;  %v1729_v41 = vld [vmem:[%s1933_s10 + $0x80] sm:$0xff]  ;;  %v1730_v45 = vld [vmem:[%s1933_s10 + $0x88] sm:$0xff]  ;;  %v1731_v49 = vld [vmem:[%s1933_s10 + $0x90] sm:$0xff]  ;;  %s2026_s21 = scalar_lea.vmem %s2190_s4, %s1496_s17 }
  0x3d   : > { %v590_v38 = vand.u32 %v1532_v34, %v588_v37  ;;  %v1737_v42 = vld [vmem:[%s1933_s10 + $0xc0] sm:$0xff]  ;;  %v1738_v46 = vld [vmem:[%s1933_s10 + $0xc8] sm:$0xff]  ;;  %v1739_v50 = vld [vmem:[%s1933_s10 + $0xd0] sm:$0xff] }
  0x3e   : > { %v1715_v51 = vld [vmem:[%s1933_s10 + $0x18] sm:$0xff]  ;;  %v1716_v55 = vld [vmem:[%s1933_s10 + $0x20] sm:$0xff]  ;;  %v1717_v59 = vld [vmem:[%s1933_s10 + $0x28] sm:$0xff] }
  0x3f   : > { %599 = vmatpush.bf16.msra.mxu0 %v590_v38  ;;  %817 = vmatpush.bf16.msra.mxu1 %v590_v38  ;;  %v1724_v52 = vld [vmem:[%s1933_s10 + $0x58] sm:$0xff]  ;;  %v1725_v56 = vld [vmem:[%s1933_s10 + $0x60] sm:$0xff]  ;;  %v1726_v60 = vld [vmem:[%s1933_s10 + $0x68] sm:$0xff] }
  0x40   : > { %1043 = vmatpush.bf16.msra.mxu2 %v590_v38  ;;  %1269 = vmatpush.bf16.msra.mxu3 %v590_v38  ;;  %v1732_v53 = vld [vmem:[%s1933_s10 + $0x98] sm:$0xff]  ;;  %v1733_v57 = vld [vmem:[%s1933_s10 + $0xa0] sm:$0xff]  ;;  %v1734_v61 = vld [vmem:[%s1933_s10 + $0xa8] sm:$0xff] }
  0x41   : > { %v1740_v54 = vld [vmem:[%s1933_s10 + $0xd8] sm:$0xff]  ;;  %v1741_v58 = vld [vmem:[%s1933_s10 + $0xe0] sm:$0xff]  ;;  %v1742_v62 = vld [vmem:[%s1933_s10 + $0xe8] sm:$0xff] }
  0x42   : > { %1533 = vmatmul.msk.bf16.vlgmr.msra.gmra.mxu0 %vm560_vm2, %v1712_v39  ;;  %1589 = vmatmul.msk.bf16.vlgmr.msra.gmra.mxu1 %vm560_vm2, %v1721_v40  ;;  %v1718_v63 = vld [vmem:[%s1933_s10 + $0x30] sm:$0xff]  ;;  %v1719_v3 = vld [vmem:[%s1933_s10 + $0x38] sm:$0xff]  ;;  %v2002_v7 = vld [vmem:[%s2188_s2] ss:$0 sm:$0xff] }
  0x43   : > { %1645 = vmatmul.msk.bf16.vlgmr.msra.gmra.mxu2 %vm560_vm2, %v1729_v41  ;;  %1701 = vmatmul.msk.bf16.vlgmr.msra.gmra.mxu3 %vm560_vm2, %v1737_v42  ;;  %v1727_v0 = vld [vmem:[%s1933_s10 + $0x70] sm:$0xff]  ;;  %v1728_v4 = vld [vmem:[%s1933_s10 + $0x78] sm:$0xff]  ;;  %v2007_v8 = vld [vmem:[%s2189_s3] ss:$0 sm:$0xff] }
  0x44   : > { %v1735_v1 = vld [vmem:[%s1933_s10 + $0xb0] sm:$0xff]  ;;  %v1736_v5 = vld [vmem:[%s1933_s10 + $0xb8] sm:$0xff] }
  0x45   : > { %v1743_v2 = vld [vmem:[%s1933_s10 + $0xf0] sm:$0xff]  ;;  %v1744_v6 = vld [vmem:[%s1933_s10 + $0xf8] sm:$0xff] }
  0x52   : > { %1534 = vmatmul.msk.bf16.gmra.mxu0 %vm560_vm2, %v1713_v43  ;;  %1590 = vmatmul.msk.bf16.gmra.mxu1 %vm560_vm2, %v1722_v44 }
  0x53   : > { %1646 = vmatmul.msk.bf16.gmra.mxu2 %vm560_vm2, %v1730_v45  ;;  %1702 = vmatmul.msk.bf16.gmra.mxu3 %vm560_vm2, %v1738_v46 }
  0x62   : > { %1535 = vmatmul.msk.bf16.gmra.mxu0 %vm560_vm2, %v1714_v47  ;;  %1591 = vmatmul.msk.bf16.gmra.mxu1 %vm560_vm2, %v1723_v48 }
  0x63   : > { %1647 = vmatmul.msk.bf16.gmra.mxu2 %vm560_vm2, %v1731_v49  ;;  %1703 = vmatmul.msk.bf16.gmra.mxu3 %vm560_vm2, %v1739_v50 }
  0x72   : > { %1536 = vmatmul.msk.bf16.gmra.mxu0 %vm560_vm2, %v1715_v51  ;;  %1592 = vmatmul.msk.bf16.gmra.mxu1 %vm560_vm2, %v1724_v52 }
  0x73   : > { %1648 = vmatmul.msk.bf16.gmra.mxu2 %vm560_vm2, %v1732_v53  ;;  %1704 = vmatmul.msk.bf16.gmra.mxu3 %vm560_vm2, %v1740_v54 }
  0x82   : > { %1537 = vmatmul.msk.bf16.gmra.mxu0 %vm560_vm2, %v1716_v55  ;;  %1593 = vmatmul.msk.bf16.gmra.mxu1 %vm560_vm2, %v1725_v56 }
  0x83   : > { %1649 = vmatmul.msk.bf16.gmra.mxu2 %vm560_vm2, %v1733_v57  ;;  %1705 = vmatmul.msk.bf16.gmra.mxu3 %vm560_vm2, %v1741_v58 }
  0x92   : > { %1538 = vmatmul.msk.bf16.gmra.mxu0 %vm560_vm2, %v1717_v59  ;;  %1594 = vmatmul.msk.bf16.gmra.mxu1 %vm560_vm2, %v1726_v60 }
  0x93   : > { %1650 = vmatmul.msk.bf16.gmra.mxu2 %vm560_vm2, %v1734_v61  ;;  %1706 = vmatmul.msk.bf16.gmra.mxu3 %vm560_vm2, %v1742_v62 }
  0xa2   : > { %1539 = vmatmul.msk.bf16.gmra.mxu0 %vm560_vm2, %v1718_v63  ;;  %1595 = vmatmul.msk.bf16.gmra.mxu1 %vm560_vm2, %v1727_v0 }
  0xa3   : > { %1651 = vmatmul.msk.bf16.gmra.mxu2 %vm560_vm2, %v1735_v1  ;;  %1707 = vmatmul.msk.bf16.gmra.mxu3 %vm560_vm2, %v1743_v2 }
  0xb2   : > { %1540 = vmatmul.msk.bf16.gmra.mxu0 %vm560_vm2, %v1719_v3  ;;  %1596 = vmatmul.msk.bf16.gmra.mxu1 %vm560_vm2, %v1728_v4 }
  0xb3   : > { %1652 = vmatmul.msk.bf16.gmra.mxu2 %vm560_vm2, %v1736_v5  ;;  %1708 = vmatmul.msk.bf16.gmra.mxu3 %vm560_vm2, %v1744_v6 }
  0xbf   : > { %v601_v9 = vpop.f32.mrf.mxu0  ;;  %v819_v10 = vpop.f32.mrf.mxu1 }
  0xc0   : > { %v645_v11 = vmul.f32 %v2002_v7, %v601_v9  ;;  %v859_v12 = vmul.f32 %v2002_v7, %v819_v10 }
  0xc2   : > { %v665_v13 = vadd.f32 %v2007_v8, %v645_v11  ;;  %v875_v14 = vadd.f32 %v2007_v8, %v859_v12 }
  0xc4   : > { %v697_v15 = vmul.f32 0.01, %v665_v13  ;;  %v907_v16 = vmul.f32 0.01, %v875_v14  ;;  %vm681_vm3 = vcmp.ge.f32.partialorder %v665_v13, 0.0  ;;  %vm891_vm4 = vcmp.ge.f32.partialorder %v875_v14, 0.0 }
  0xc6   : > { %v1045_v17 = vpop.f32.mrf.mxu2  ;;  %v1271_v18 = vpop.f32.mrf.mxu3  ;;  %v713_v25 = vsel %vm681_vm3, %v665_v13, %v697_v15  ;;  %v923_v26 = vsel %vm891_vm4, %v875_v14, %v907_v16 }
  0xc7   : > { %v1085_v19 = vmul.f32 %v2002_v7, %v1045_v17  ;;  %v1311_v20 = vmul.f32 %v2002_v7, %v1271_v18  ;;  %v603_v21 = vpop.f32.mrf.mxu0  ;;  %v821_v22 = vpop.f32.mrf.mxu1  ;;  %v939_v33 = vmax.f32 %v713_v25, %v923_v26 }
  0xc8   : > { %v646_v23 = vmul.f32 %v2002_v7, %v603_v21  ;;  %v860_v24 = vmul.f32 %v2002_v7, %v821_v22 }
  0xc9   : > { %v1101_v27 = vadd.f32 %v2007_v8, %v1085_v19  ;;  %v1327_v28 = vadd.f32 %v2007_v8, %v1311_v20 }
  0xca   : > { %v666_v29 = vadd.f32 %v2007_v8, %v646_v23  ;;  %v876_v30 = vadd.f32 %v2007_v8, %v860_v24 }
  0xcb   : > { %vm1117_vm5 = vcmp.ge.f32.partialorder %v1101_v27, 0.0  ;;  %v1133_v31 = vmul.f32 0.01, %v1101_v27  ;;  %v1359_v32 = vmul.f32 0.01, %v1327_v28  ;;  %vm1343_vm6 = vcmp.ge.f32.partialorder %v1327_v28, 0.0 }
  0xcc   : > { %v698_v35 = vmul.f32 0.01, %v666_v29  ;;  %v908_v36 = vmul.f32 0.01, %v876_v30  ;;  %vm682_vm7 = vcmp.ge.f32.partialorder %v666_v29, 0.0  ;;  %vm892_vm8 = vcmp.ge.f32.partialorder %v876_v30, 0.0 }
  0xcd   : > { %v1149_v34 = vsel %vm1117_vm5, %v1101_v27, %v1133_v31  ;;  %v1375_v40 = vsel %vm1343_vm6, %v1327_v28, %v1359_v32 }
  0xce   : > { %v1165_v37 = vmax.f32 %v939_v33, %v1149_v34  ;;  %v1047_v38 = vpop.f32.mrf.mxu2  ;;  %v1273_v39 = vpop.f32.mrf.mxu3  ;;  %v714_v48 = vsel %vm682_vm7, %v666_v29, %v698_v35  ;;  %v924_v49 = vsel %vm892_vm8, %v876_v30, %v908_v36 }
  0xcf   : > { %v1086_v41 = vmul.f32 %v2002_v7, %v1047_v38  ;;  %v1312_v42 = vmul.f32 %v2002_v7, %v1273_v39  ;;  %v606_v43 = vpop.f32.mrf.mxu0  ;;  %v824_v44 = vpop.f32.mrf.mxu1  ;;  %v940_v56 = vmax.f32 %v714_v48, %v924_v49 }
  0xd0   : > { %v1391_v45 = vmax.f32 %v1165_v37, %v1375_v40  ;;  %v647_v46 = vmul.f32 %v2002_v7, %v606_v43  ;;  %v861_v47 = vmul.f32 %v2002_v7, %v824_v44 }
  0xd1   : > { %v1102_v50 = vadd.f32 %v2007_v8, %v1086_v41  ;;  %v1328_v51 = vadd.f32 %v2007_v8, %v1312_v42 }
  0xd2   : > { %1408 = vst.msk [vmem:[%s2026_s21] sm:$0xff] %vm1407_vm9, %v1391_v45  ;;  %v667_v52 = vadd.f32 %v2007_v8, %v647_v46  ;;  %v877_v53 = vadd.f32 %v2007_v8, %v861_v47 }
  0xd3   : > { %vm1118_vm10 = vcmp.ge.f32.partialorder %v1102_v50, 0.0  ;;  %v1134_v54 = vmul.f32 0.01, %v1102_v50  ;;  %v1360_v55 = vmul.f32 0.01, %v1328_v51  ;;  %vm1344_vm11 = vcmp.ge.f32.partialorder %v1328_v51, 0.0 }
  0xd4   : > { %v699_v58 = vmul.f32 0.01, %v667_v52  ;;  %v909_v59 = vmul.f32 0.01, %v877_v53  ;;  %vm683_vm12 = vcmp.ge.f32.partialorder %v667_v52, 0.0  ;;  %vm893_vm13 = vcmp.ge.f32.partialorder %v877_v53, 0.0 }
  0xd5   : > { %v1150_v57 = vsel %vm1118_vm10, %v1102_v50, %v1134_v54  ;;  %v1376_v63 = vsel %vm1344_vm11, %v1328_v51, %v1360_v55 }
  0xd6   : > { %v1166_v60 = vmax.f32 %v940_v56, %v1150_v57  ;;  %v1050_v61 = vpop.f32.mrf.mxu2  ;;  %v1276_v62 = vpop.f32.mrf.mxu3  ;;  %v715_v9 = vsel %vm683_vm12, %v667_v52, %v699_v58  ;;  %v925_v10 = vsel %vm893_vm13, %v877_v53, %v909_v59 }
  0xd7   : > { %v1087_v0 = vmul.f32 %v2002_v7, %v1050_v61  ;;  %v1313_v1 = vmul.f32 %v2002_v7, %v1276_v62  ;;  %v608_v2 = vpop.f32.mrf.mxu0  ;;  %v826_v3 = vpop.f32.mrf.mxu1  ;;  %v941_v17 = vmax.f32 %v715_v9, %v925_v10 }
  0xd8   : > { %v1392_v4 = vmax.f32 %v1166_v60, %v1376_v63  ;;  %v648_v5 = vmul.f32 %v2002_v7, %v608_v2  ;;  %v862_v6 = vmul.f32 %v2002_v7, %v826_v3 }
  0xd9   : > { %v1103_v11 = vadd.f32 %v2007_v8, %v1087_v0  ;;  %v1329_v12 = vadd.f32 %v2007_v8, %v1313_v1 }
  0xda   : > { %1409 = vst.msk [vmem:[%s2026_s21 + $0x8] sm:$0xff] %vm1407_vm9, %v1392_v4  ;;  %v668_v13 = vadd.f32 %v2007_v8, %v648_v5  ;;  %v878_v14 = vadd.f32 %v2007_v8, %v862_v6 }
  0xdb   : > { %vm1119_vm14 = vcmp.ge.f32.partialorder %v1103_v11, 0.0  ;;  %v1135_v15 = vmul.f32 0.01, %v1103_v11  ;;  %v1361_v16 = vmul.f32 0.01, %v1329_v12  ;;  %vm1345_vm15 = vcmp.ge.f32.partialorder %v1329_v12, 0.0 }
  0xdc   : > { %v700_v19 = vmul.f32 0.01, %v668_v13  ;;  %v910_v20 = vmul.f32 0.01, %v878_v14  ;;  %vm684_vm0 = vcmp.ge.f32.partialorder %v668_v13, 0.0  ;;  %vm894_vm1 = vcmp.ge.f32.partialorder %v878_v14, 0.0 }
  0xdd   : > { %v1151_v18 = vsel %vm1119_vm14, %v1103_v11, %v1135_v15  ;;  %v1377_v24 = vsel %vm1345_vm15, %v1329_v12, %v1361_v16 }
  0xde   : > { %v1167_v21 = vmax.f32 %v941_v17, %v1151_v18  ;;  %v1052_v22 = vpop.f32.mrf.mxu2  ;;  %v1278_v23 = vpop.f32.mrf.mxu3  ;;  %v716_v32 = vsel %vm684_vm0, %v668_v13, %v700_v19  ;;  %v926_v33 = vsel %vm894_vm1, %v878_v14, %v910_v20 }
  0xdf   : > { %v1088_v25 = vmul.f32 %v2002_v7, %v1052_v22  ;;  %v1314_v26 = vmul.f32 %v2002_v7, %v1278_v23  ;;  %v611_v27 = vpop.f32.mrf.mxu0  ;;  %v829_v28 = vpop.f32.mrf.mxu1  ;;  %v942_v40 = vmax.f32 %v716_v32, %v926_v33 }
  0xe0   : > { %v1393_v29 = vmax.f32 %v1167_v21, %v1377_v24  ;;  %v649_v30 = vmul.f32 %v2002_v7, %v611_v27  ;;  %v863_v31 = vmul.f32 %v2002_v7, %v829_v28 }
  0xe1   : > { %v1104_v34 = vadd.f32 %v2007_v8, %v1088_v25  ;;  %v1330_v35 = vadd.f32 %v2007_v8, %v1314_v26 }
  0xe2   : > { %1410 = vst.msk [vmem:[%s2026_s21 + $0x10] sm:$0xff] %vm1407_vm9, %v1393_v29  ;;  %v669_v36 = vadd.f32 %v2007_v8, %v649_v30  ;;  %v879_v37 = vadd.f32 %v2007_v8, %v863_v31 }
  0xe3   : > { %vm1120_vm2 = vcmp.ge.f32.partialorder %v1104_v34, 0.0  ;;  %v1136_v38 = vmul.f32 0.01, %v1104_v34  ;;  %v1362_v39 = vmul.f32 0.01, %v1330_v35  ;;  %vm1346_vm3 = vcmp.ge.f32.partialorder %v1330_v35, 0.0 }
  0xe4   : > { %v701_v42 = vmul.f32 0.01, %v669_v36  ;;  %v911_v43 = vmul.f32 0.01, %v879_v37  ;;  %vm685_vm4 = vcmp.ge.f32.partialorder %v669_v36, 0.0  ;;  %vm895_vm5 = vcmp.ge.f32.partialorder %v879_v37, 0.0 }
  0xe5   : > { %v1152_v41 = vsel %vm1120_vm2, %v1104_v34, %v1136_v38  ;;  %v1378_v47 = vsel %vm1346_vm3, %v1330_v35, %v1362_v39 }
  0xe6   : > { %v1168_v44 = vmax.f32 %v942_v40, %v1152_v41  ;;  %v1055_v45 = vpop.f32.mrf.mxu2  ;;  %v1281_v46 = vpop.f32.mrf.mxu3  ;;  %v717_v55 = vsel %vm685_vm4, %v669_v36, %v701_v42  ;;  %v927_v56 = vsel %vm895_vm5, %v879_v37, %v911_v43 }
  0xe7   : > { %v1089_v48 = vmul.f32 %v2002_v7, %v1055_v45  ;;  %v1315_v49 = vmul.f32 %v2002_v7, %v1281_v46  ;;  %v613_v50 = vpop.f32.mrf.mxu0  ;;  %v831_v51 = vpop.f32.mrf.mxu1  ;;  %v943_v63 = vmax.f32 %v717_v55, %v927_v56 }
  0xe8   : > { %v1394_v52 = vmax.f32 %v1168_v44, %v1378_v47  ;;  %v650_v53 = vmul.f32 %v2002_v7, %v613_v50  ;;  %v864_v54 = vmul.f32 %v2002_v7, %v831_v51 }
  0xe9   : > { %v1105_v57 = vadd.f32 %v2007_v8, %v1089_v48  ;;  %v1331_v58 = vadd.f32 %v2007_v8, %v1315_v49 }
  0xea   : > { %1411 = vst.msk [vmem:[%s2026_s21 + $0x18] sm:$0xff] %vm1407_vm9, %v1394_v52  ;;  %v670_v59 = vadd.f32 %v2007_v8, %v650_v53  ;;  %v880_v60 = vadd.f32 %v2007_v8, %v864_v54 }
  0xeb   : > { %vm1121_vm6 = vcmp.ge.f32.partialorder %v1105_v57, 0.0  ;;  %v1137_v61 = vmul.f32 0.01, %v1105_v57  ;;  %v1363_v62 = vmul.f32 0.01, %v1331_v58  ;;  %vm1347_vm7 = vcmp.ge.f32.partialorder %v1331_v58, 0.0 }
  0xec   : > { %v702_v1 = vmul.f32 0.01, %v670_v59  ;;  %v912_v2 = vmul.f32 0.01, %v880_v60  ;;  %vm686_vm8 = vcmp.ge.f32.partialorder %v670_v59, 0.0  ;;  %vm896_vm10 = vcmp.ge.f32.partialorder %v880_v60, 0.0 }
  0xed   : > { %v1153_v0 = vsel %vm1121_vm6, %v1105_v57, %v1137_v61  ;;  %v1379_v6 = vsel %vm1347_vm7, %v1331_v58, %v1363_v62 }
  0xee   : > { %v1169_v3 = vmax.f32 %v943_v63, %v1153_v0  ;;  %v1057_v4 = vpop.f32.mrf.mxu2  ;;  %v1283_v5 = vpop.f32.mrf.mxu3  ;;  %v718_v16 = vsel %vm686_vm8, %v670_v59, %v702_v1  ;;  %v928_v17 = vsel %vm896_vm10, %v880_v60, %v912_v2 }
  0xef   : > { %v1090_v9 = vmul.f32 %v2002_v7, %v1057_v4  ;;  %v1316_v10 = vmul.f32 %v2002_v7, %v1283_v5  ;;  %v616_v11 = vpop.f32.mrf.mxu0  ;;  %v834_v12 = vpop.f32.mrf.mxu1  ;;  %v944_v24 = vmax.f32 %v718_v16, %v928_v17 }
  0xf0   : > { %v1395_v13 = vmax.f32 %v1169_v3, %v1379_v6  ;;  %v651_v14 = vmul.f32 %v2002_v7, %v616_v11  ;;  %v865_v15 = vmul.f32 %v2002_v7, %v834_v12 }
  0xf1   : > { %v1106_v18 = vadd.f32 %v2007_v8, %v1090_v9  ;;  %v1332_v19 = vadd.f32 %v2007_v8, %v1316_v10 }
  0xf2   : > { %1412 = vst.msk [vmem:[%s2026_s21 + $0x20] sm:$0xff] %vm1407_vm9, %v1395_v13  ;;  %v671_v20 = vadd.f32 %v2007_v8, %v651_v14  ;;  %v881_v21 = vadd.f32 %v2007_v8, %v865_v15 }
  0xf3   : > { %vm1122_vm11 = vcmp.ge.f32.partialorder %v1106_v18, 0.0  ;;  %v1138_v22 = vmul.f32 0.01, %v1106_v18  ;;  %v1364_v23 = vmul.f32 0.01, %v1332_v19  ;;  %vm1348_vm12 = vcmp.ge.f32.partialorder %v1332_v19, 0.0 }
  0xf4   : > { %v703_v26 = vmul.f32 0.01, %v671_v20  ;;  %v913_v27 = vmul.f32 0.01, %v881_v21  ;;  %vm687_vm13 = vcmp.ge.f32.partialorder %v671_v20, 0.0  ;;  %vm897_vm14 = vcmp.ge.f32.partialorder %v881_v21, 0.0 }
  0xf5   : > { %v1154_v25 = vsel %vm1122_vm11, %v1106_v18, %v1138_v22  ;;  %v1380_v31 = vsel %vm1348_vm12, %v1332_v19, %v1364_v23 }
  0xf6   : > { %v1170_v28 = vmax.f32 %v944_v24, %v1154_v25  ;;  %v1060_v29 = vpop.f32.mrf.mxu2  ;;  %v1286_v30 = vpop.f32.mrf.mxu3  ;;  %v719_v39 = vsel %vm687_vm13, %v671_v20, %v703_v26  ;;  %v929_v40 = vsel %vm897_vm14, %v881_v21, %v913_v27 }
  0xf7   : > { %v1091_v32 = vmul.f32 %v2002_v7, %v1060_v29  ;;  %v1317_v33 = vmul.f32 %v2002_v7, %v1286_v30  ;;  %v618_v34 = vpop.f32.mrf.mxu0  ;;  %v836_v35 = vpop.f32.mrf.mxu1  ;;  %v945_v47 = vmax.f32 %v719_v39, %v929_v40 }
  0xf8   : > { %v1396_v36 = vmax.f32 %v1170_v28, %v1380_v31  ;;  %v652_v37 = vmul.f32 %v2002_v7, %v618_v34  ;;  %v866_v38 = vmul.f32 %v2002_v7, %v836_v35 }
  0xf9   : > { %v1107_v41 = vadd.f32 %v2007_v8, %v1091_v32  ;;  %v1333_v42 = vadd.f32 %v2007_v8, %v1317_v33 }
  0xfa   : > { %1413 = vst.msk [vmem:[%s2026_s21 + $0x28] sm:$0xff] %vm1407_vm9, %v1396_v36  ;;  %v672_v43 = vadd.f32 %v2007_v8, %v652_v37  ;;  %v882_v44 = vadd.f32 %v2007_v8, %v866_v38 }
  0xfb   : > { %vm1123_vm15 = vcmp.ge.f32.partialorder %v1107_v41, 0.0  ;;  %v1139_v45 = vmul.f32 0.01, %v1107_v41  ;;  %v1365_v46 = vmul.f32 0.01, %v1333_v42  ;;  %vm1349_vm0 = vcmp.ge.f32.partialorder %v1333_v42, 0.0 }
  0xfc   : > { %v704_v49 = vmul.f32 0.01, %v672_v43  ;;  %v914_v50 = vmul.f32 0.01, %v882_v44  ;;  %vm688_vm1 = vcmp.ge.f32.partialorder %v672_v43, 0.0  ;;  %vm898_vm2 = vcmp.ge.f32.partialorder %v882_v44, 0.0 }
  0xfd   : > { %v1155_v48 = vsel %vm1123_vm15, %v1107_v41, %v1139_v45  ;;  %v1381_v54 = vsel %vm1349_vm0, %v1333_v42, %v1365_v46 }
  0xfe   : > { %v1171_v51 = vmax.f32 %v945_v47, %v1155_v48  ;;  %v1062_v52 = vpop.f32.mrf.mxu2  ;;  %v1288_v53 = vpop.f32.mrf.mxu3  ;;  %v720_v62 = vsel %vm688_vm1, %v672_v43, %v704_v49  ;;  %v930_v63 = vsel %vm898_vm2, %v882_v44, %v914_v50 }
  0xff   : > { %v1092_v55 = vmul.f32 %v2002_v7, %v1062_v52  ;;  %v1318_v56 = vmul.f32 %v2002_v7, %v1288_v53  ;;  %v621_v57 = vpop.f32.mrf.mxu0  ;;  %v839_v58 = vpop.f32.mrf.mxu1  ;;  %v946_v6 = vmax.f32 %v720_v62, %v930_v63 }
 0x100   : > { %v1397_v59 = vmax.f32 %v1171_v51, %v1381_v54  ;;  %v653_v60 = vmul.f32 %v2002_v7, %v621_v57  ;;  %v867_v61 = vmul.f32 %v2002_v7, %v839_v58 }
 0x101   : > { %v1108_v0 = vadd.f32 %v2007_v8, %v1092_v55  ;;  %v1334_v1 = vadd.f32 %v2007_v8, %v1318_v56 }
 0x102   : > { %1414 = vst.msk [vmem:[%s2026_s21 + $0x30] sm:$0xff] %vm1407_vm9, %v1397_v59  ;;  %v673_v2 = vadd.f32 %v2007_v8, %v653_v60  ;;  %v883_v3 = vadd.f32 %v2007_v8, %v867_v61 }
 0x103   : > { %vm1124_vm3 = vcmp.ge.f32.partialorder %v1108_v0, 0.0  ;;  %v1140_v4 = vmul.f32 0.01, %v1108_v0  ;;  %v1366_v5 = vmul.f32 0.01, %v1334_v1  ;;  %vm1350_vm4 = vcmp.ge.f32.partialorder %v1334_v1, 0.0 }
 0x104   : > { %v705_v10 = vmul.f32 0.01, %v673_v2  ;;  %v915_v11 = vmul.f32 0.01, %v883_v3  ;;  %vm689_vm5 = vcmp.ge.f32.partialorder %v673_v2, 0.0  ;;  %vm899_vm6 = vcmp.ge.f32.partialorder %v883_v3, 0.0 }
 0x105   : > { %v1156_v9 = vsel %vm1124_vm3, %v1108_v0, %v1140_v4  ;;  %v1382_v15 = vsel %vm1350_vm4, %v1334_v1, %v1366_v5 }
 0x106   : > { %v1172_v12 = vmax.f32 %v946_v6, %v1156_v9  ;;  %v1065_v13 = vpop.f32.mrf.mxu2  ;;  %v1291_v14 = vpop.f32.mrf.mxu3  ;;  %v721_v23 = vsel %vm689_vm5, %v673_v2, %v705_v10  ;;  %v931_v24 = vsel %vm899_vm6, %v883_v3, %v915_v11 }
 0x107   : > { %v1093_v16 = vmul.f32 %v2002_v7, %v1065_v13  ;;  %v1319_v17 = vmul.f32 %v2002_v7, %v1291_v14  ;;  %v623_v18 = vpop.f32.mrf.mxu0  ;;  %v841_v19 = vpop.f32.mrf.mxu1  ;;  %v947_v31 = vmax.f32 %v721_v23, %v931_v24 }
 0x108   : > { %v1398_v20 = vmax.f32 %v1172_v12, %v1382_v15  ;;  %v654_v21 = vmul.f32 %v2002_v7, %v623_v18  ;;  %v868_v22 = vmul.f32 %v2002_v7, %v841_v19 }
 0x109   : > { %v1109_v25 = vadd.f32 %v2007_v8, %v1093_v16  ;;  %v1335_v26 = vadd.f32 %v2007_v8, %v1319_v17 }
 0x10a   : > { %1415 = vst.msk [vmem:[%s2026_s21 + $0x38] sm:$0xff] %vm1407_vm9, %v1398_v20  ;;  %v674_v27 = vadd.f32 %v2007_v8, %v654_v21  ;;  %v884_v28 = vadd.f32 %v2007_v8, %v868_v22 }
 0x10b   : > { %vm1125_vm7 = vcmp.ge.f32.partialorder %v1109_v25, 0.0  ;;  %v1141_v29 = vmul.f32 0.01, %v1109_v25  ;;  %v1367_v30 = vmul.f32 0.01, %v1335_v26  ;;  %vm1351_vm8 = vcmp.ge.f32.partialorder %v1335_v26, 0.0 }
 0x10c   : > { %v706_v33 = vmul.f32 0.01, %v674_v27  ;;  %v916_v34 = vmul.f32 0.01, %v884_v28  ;;  %vm690_vm10 = vcmp.ge.f32.partialorder %v674_v27, 0.0  ;;  %vm900_vm11 = vcmp.ge.f32.partialorder %v884_v28, 0.0 }
 0x10d   : > { %v1157_v32 = vsel %vm1125_vm7, %v1109_v25, %v1141_v29  ;;  %v1383_v38 = vsel %vm1351_vm8, %v1335_v26, %v1367_v30 }
 0x10e   : > { %v1173_v35 = vmax.f32 %v947_v31, %v1157_v32  ;;  %v1067_v36 = vpop.f32.mrf.mxu2  ;;  %v1293_v37 = vpop.f32.mrf.mxu3  ;;  %v722_v46 = vsel %vm690_vm10, %v674_v27, %v706_v33  ;;  %v932_v47 = vsel %vm900_vm11, %v884_v28, %v916_v34 }
 0x10f   : > { %v1094_v39 = vmul.f32 %v2002_v7, %v1067_v36  ;;  %v1320_v40 = vmul.f32 %v2002_v7, %v1293_v37  ;;  %v626_v41 = vpop.f32.mrf.mxu0  ;;  %v844_v42 = vpop.f32.mrf.mxu1  ;;  %v948_v54 = vmax.f32 %v722_v46, %v932_v47 }
 0x110   : > { %v1399_v43 = vmax.f32 %v1173_v35, %v1383_v38  ;;  %v655_v44 = vmul.f32 %v2002_v7, %v626_v41  ;;  %v869_v45 = vmul.f32 %v2002_v7, %v844_v42 }
 0x111   : > { %v1110_v48 = vadd.f32 %v2007_v8, %v1094_v39  ;;  %v1336_v49 = vadd.f32 %v2007_v8, %v1320_v40 }
 0x112   : > { %1416 = vst.msk [vmem:[%s2026_s21 + $0x40] sm:$0xff] %vm1407_vm9, %v1399_v43  ;;  %v675_v50 = vadd.f32 %v2007_v8, %v655_v44  ;;  %v885_v51 = vadd.f32 %v2007_v8, %v869_v45 }
 0x113   : > { %vm1126_vm12 = vcmp.ge.f32.partialorder %v1110_v48, 0.0  ;;  %v1142_v52 = vmul.f32 0.01, %v1110_v48  ;;  %v1368_v53 = vmul.f32 0.01, %v1336_v49  ;;  %vm1352_vm13 = vcmp.ge.f32.partialorder %v1336_v49, 0.0 }
 0x114   : > { %v707_v56 = vmul.f32 0.01, %v675_v50  ;;  %v917_v57 = vmul.f32 0.01, %v885_v51  ;;  %vm691_vm14 = vcmp.ge.f32.partialorder %v675_v50, 0.0  ;;  %vm901_vm15 = vcmp.ge.f32.partialorder %v885_v51, 0.0 }
 0x115   : > { %v1158_v55 = vsel %vm1126_vm12, %v1110_v48, %v1142_v52  ;;  %v1384_v61 = vsel %vm1352_vm13, %v1336_v49, %v1368_v53 }
 0x116   : > { %v1174_v58 = vmax.f32 %v948_v54, %v1158_v55  ;;  %v1070_v59 = vpop.f32.mrf.mxu2  ;;  %v1296_v60 = vpop.f32.mrf.mxu3  ;;  %v723_v5 = vsel %vm691_vm14, %v675_v50, %v707_v56  ;;  %v933_v6 = vsel %vm901_vm15, %v885_v51, %v917_v57 }
 0x117   : > { %v1095_v62 = vmul.f32 %v2002_v7, %v1070_v59  ;;  %v1321_v63 = vmul.f32 %v2002_v7, %v1296_v60  ;;  %v628_v0 = vpop.f32.mrf.mxu0  ;;  %v846_v1 = vpop.f32.mrf.mxu1  ;;  %v949_v15 = vmax.f32 %v723_v5, %v933_v6 }
 0x118   : > { %v1400_v2 = vmax.f32 %v1174_v58, %v1384_v61  ;;  %v656_v3 = vmul.f32 %v2002_v7, %v628_v0  ;;  %v870_v4 = vmul.f32 %v2002_v7, %v846_v1 }
 0x119   : > { %v1111_v9 = vadd.f32 %v2007_v8, %v1095_v62  ;;  %v1337_v10 = vadd.f32 %v2007_v8, %v1321_v63 }
 0x11a   : > { %1417 = vst.msk [vmem:[%s2026_s21 + $0x48] sm:$0xff] %vm1407_vm9, %v1400_v2  ;;  %v676_v11 = vadd.f32 %v2007_v8, %v656_v3  ;;  %v886_v12 = vadd.f32 %v2007_v8, %v870_v4 }
 0x11b   : > { %vm1127_vm0 = vcmp.ge.f32.partialorder %v1111_v9, 0.0  ;;  %v1143_v13 = vmul.f32 0.01, %v1111_v9  ;;  %v1369_v14 = vmul.f32 0.01, %v1337_v10  ;;  %vm1353_vm1 = vcmp.ge.f32.partialorder %v1337_v10, 0.0 }
 0x11c   : > { %v708_v17 = vmul.f32 0.01, %v676_v11  ;;  %v918_v18 = vmul.f32 0.01, %v886_v12  ;;  %vm692_vm2 = vcmp.ge.f32.partialorder %v676_v11, 0.0  ;;  %vm902_vm3 = vcmp.ge.f32.partialorder %v886_v12, 0.0 }
 0x11d   : > { %v1159_v16 = vsel %vm1127_vm0, %v1111_v9, %v1143_v13  ;;  %v1385_v22 = vsel %vm1353_vm1, %v1337_v10, %v1369_v14 }
 0x11e   : > { %v1175_v19 = vmax.f32 %v949_v15, %v1159_v16  ;;  %v1072_v20 = vpop.f32.mrf.mxu2  ;;  %v1298_v21 = vpop.f32.mrf.mxu3  ;;  %v724_v30 = vsel %vm692_vm2, %v676_v11, %v708_v17  ;;  %v934_v31 = vsel %vm902_vm3, %v886_v12, %v918_v18 }
 0x11f   : > { %v1096_v23 = vmul.f32 %v2002_v7, %v1072_v20  ;;  %v1322_v24 = vmul.f32 %v2002_v7, %v1298_v21  ;;  %v631_v25 = vpop.f32.mrf.mxu0  ;;  %v849_v26 = vpop.f32.mrf.mxu1  ;;  %v950_v38 = vmax.f32 %v724_v30, %v934_v31 }
 0x120   : > { %v1401_v27 = vmax.f32 %v1175_v19, %v1385_v22  ;;  %v657_v28 = vmul.f32 %v2002_v7, %v631_v25  ;;  %v871_v29 = vmul.f32 %v2002_v7, %v849_v26 }
 0x121   : > { %v1112_v32 = vadd.f32 %v2007_v8, %v1096_v23  ;;  %v1338_v33 = vadd.f32 %v2007_v8, %v1322_v24 }
 0x122   : > { %1418 = vst.msk [vmem:[%s2026_s21 + $0x50] sm:$0xff] %vm1407_vm9, %v1401_v27  ;;  %v677_v34 = vadd.f32 %v2007_v8, %v657_v28  ;;  %v887_v35 = vadd.f32 %v2007_v8, %v871_v29 }
 0x123   : > { %vm1128_vm4 = vcmp.ge.f32.partialorder %v1112_v32, 0.0  ;;  %v1144_v36 = vmul.f32 0.01, %v1112_v32  ;;  %v1370_v37 = vmul.f32 0.01, %v1338_v33  ;;  %vm1354_vm5 = vcmp.ge.f32.partialorder %v1338_v33, 0.0 }
 0x124   : > { %v709_v40 = vmul.f32 0.01, %v677_v34  ;;  %v919_v41 = vmul.f32 0.01, %v887_v35  ;;  %vm693_vm6 = vcmp.ge.f32.partialorder %v677_v34, 0.0  ;;  %vm903_vm7 = vcmp.ge.f32.partialorder %v887_v35, 0.0 }
 0x125   : > { %v1160_v39 = vsel %vm1128_vm4, %v1112_v32, %v1144_v36  ;;  %v1386_v45 = vsel %vm1354_vm5, %v1338_v33, %v1370_v37 }
 0x126   : > { %v1176_v42 = vmax.f32 %v950_v38, %v1160_v39  ;;  %v1075_v43 = vpop.f32.mrf.mxu2  ;;  %v1301_v44 = vpop.f32.mrf.mxu3  ;;  %v725_v53 = vsel %vm693_vm6, %v677_v34, %v709_v40  ;;  %v935_v54 = vsel %vm903_vm7, %v887_v35, %v919_v41 }
 0x127   : > { %v1097_v46 = vmul.f32 %v2002_v7, %v1075_v43  ;;  %v1323_v47 = vmul.f32 %v2002_v7, %v1301_v44  ;;  %v633_v48 = vpop.f32.mrf.mxu0  ;;  %v851_v49 = vpop.f32.mrf.mxu1  ;;  %v951_v61 = vmax.f32 %v725_v53, %v935_v54 }
 0x128   : > { %v1402_v50 = vmax.f32 %v1176_v42, %v1386_v45  ;;  %v658_v51 = vmul.f32 %v2002_v7, %v633_v48  ;;  %v872_v52 = vmul.f32 %v2002_v7, %v851_v49 }
 0x129   : > { %v1113_v55 = vadd.f32 %v2007_v8, %v1097_v46  ;;  %v1339_v56 = vadd.f32 %v2007_v8, %v1323_v47 }
 0x12a   : > { %1419 = vst.msk [vmem:[%s2026_s21 + $0x58] sm:$0xff] %vm1407_vm9, %v1402_v50  ;;  %v678_v57 = vadd.f32 %v2007_v8, %v658_v51  ;;  %v888_v58 = vadd.f32 %v2007_v8, %v872_v52 }
 0x12b   : > { %vm1129_vm8 = vcmp.ge.f32.partialorder %v1113_v55, 0.0  ;;  %v1145_v59 = vmul.f32 0.01, %v1113_v55  ;;  %v1371_v60 = vmul.f32 0.01, %v1339_v56  ;;  %vm1355_vm10 = vcmp.ge.f32.partialorder %v1339_v56, 0.0 }
 0x12c   : > { %v710_v63 = vmul.f32 0.01, %v678_v57  ;;  %v920_v0 = vmul.f32 0.01, %v888_v58  ;;  %vm694_vm11 = vcmp.ge.f32.partialorder %v678_v57, 0.0  ;;  %vm904_vm12 = vcmp.ge.f32.partialorder %v888_v58, 0.0 }
 0x12d   : > { %v1161_v62 = vsel %vm1129_vm8, %v1113_v55, %v1145_v59  ;;  %v1387_v4 = vsel %vm1355_vm10, %v1339_v56, %v1371_v60 }
 0x12e   : > { %v1177_v1 = vmax.f32 %v951_v61, %v1161_v62  ;;  %v1077_v2 = vpop.f32.mrf.mxu2  ;;  %v1303_v3 = vpop.f32.mrf.mxu3  ;;  %v726_v14 = vsel %vm694_vm11, %v678_v57, %v710_v63  ;;  %v936_v15 = vsel %vm904_vm12, %v888_v58, %v920_v0 }
 0x12f   : > { %v1098_v5 = vmul.f32 %v2002_v7, %v1077_v2  ;;  %v1324_v6 = vmul.f32 %v2002_v7, %v1303_v3  ;;  %v636_v9 = vpop.f32.mrf.mxu0  ;;  %v854_v10 = vpop.f32.mrf.mxu1  ;;  %v952_v22 = vmax.f32 %v726_v14, %v936_v15 }
 0x130   : > { %v1403_v11 = vmax.f32 %v1177_v1, %v1387_v4  ;;  %v659_v12 = vmul.f32 %v2002_v7, %v636_v9  ;;  %v873_v13 = vmul.f32 %v2002_v7, %v854_v10 }
 0x131   : > { %v1114_v16 = vadd.f32 %v2007_v8, %v1098_v5  ;;  %v1340_v17 = vadd.f32 %v2007_v8, %v1324_v6 }
 0x132   : > { %1420 = vst.msk [vmem:[%s2026_s21 + $0x60] sm:$0xff] %vm1407_vm9, %v1403_v11  ;;  %v679_v18 = vadd.f32 %v2007_v8, %v659_v12  ;;  %v889_v19 = vadd.f32 %v2007_v8, %v873_v13 }
 0x133   : > { %vm1130_vm13 = vcmp.ge.f32.partialorder %v1114_v16, 0.0  ;;  %v1146_v20 = vmul.f32 0.01, %v1114_v16  ;;  %v1372_v21 = vmul.f32 0.01, %v1340_v17  ;;  %vm1356_vm14 = vcmp.ge.f32.partialorder %v1340_v17, 0.0 }
 0x134   : > { %v711_v24 = vmul.f32 0.01, %v679_v18  ;;  %v921_v25 = vmul.f32 0.01, %v889_v19  ;;  %vm695_vm15 = vcmp.ge.f32.partialorder %v679_v18, 0.0  ;;  %vm905_vm0 = vcmp.ge.f32.partialorder %v889_v19, 0.0 }
 0x135   : > { %v1162_v23 = vsel %vm1130_vm13, %v1114_v16, %v1146_v20  ;;  %v1388_v29 = vsel %vm1356_vm14, %v1340_v17, %v1372_v21 }
 0x136   : > { %v1178_v26 = vmax.f32 %v952_v22, %v1162_v23  ;;  %v1080_v27 = vpop.f32.mrf.mxu2  ;;  %v1306_v28 = vpop.f32.mrf.mxu3  ;;  %v727_v37 = vsel %vm695_vm15, %v679_v18, %v711_v24  ;;  %v937_v38 = vsel %vm905_vm0, %v889_v19, %v921_v25 }
 0x137   : > { %v1099_v30 = vmul.f32 %v2002_v7, %v1080_v27  ;;  %v1325_v31 = vmul.f32 %v2002_v7, %v1306_v28  ;;  %v638_v32 = vpop.f32.mrf.mxu0  ;;  %v856_v33 = vpop.f32.mrf.mxu1  ;;  %v953_v45 = vmax.f32 %v727_v37, %v937_v38 }
 0x138   : > { %v1404_v34 = vmax.f32 %v1178_v26, %v1388_v29  ;;  %v660_v35 = vmul.f32 %v2002_v7, %v638_v32  ;;  %v874_v36 = vmul.f32 %v2002_v7, %v856_v33 }
 0x139   : > { %v1115_v39 = vadd.f32 %v2007_v8, %v1099_v30  ;;  %v1341_v40 = vadd.f32 %v2007_v8, %v1325_v31 }
 0x13a   : > { %1421 = vst.msk [vmem:[%s2026_s21 + $0x68] sm:$0xff] %vm1407_vm9, %v1404_v34  ;;  %v680_v41 = vadd.f32 %v2007_v8, %v660_v35  ;;  %v890_v42 = vadd.f32 %v2007_v8, %v874_v36 }
 0x13b   : > { %vm1131_vm1 = vcmp.ge.f32.partialorder %v1115_v39, 0.0  ;;  %v1147_v43 = vmul.f32 0.01, %v1115_v39  ;;  %v1373_v44 = vmul.f32 0.01, %v1341_v40  ;;  %vm1357_vm2 = vcmp.ge.f32.partialorder %v1341_v40, 0.0 }
 0x13c   : > { %v712_v47 = vmul.f32 0.01, %v680_v41  ;;  %v922_v48 = vmul.f32 0.01, %v890_v42  ;;  %vm696_vm3 = vcmp.ge.f32.partialorder %v680_v41, 0.0  ;;  %vm906_vm4 = vcmp.ge.f32.partialorder %v890_v42, 0.0 }
 0x13d   : > { %v1163_v46 = vsel %vm1131_vm1, %v1115_v39, %v1147_v43  ;;  %v1389_v52 = vsel %vm1357_vm2, %v1341_v40, %v1373_v44 }
 0x13e   : > { %v1179_v49 = vmax.f32 %v953_v45, %v1163_v46  ;;  %v1082_v50 = vpop.f32.mrf.mxu2  ;;  %v1308_v51 = vpop.f32.mrf.mxu3  ;;  %v728_v56 = vsel %vm696_vm3, %v680_v41, %v712_v47  ;;  %v938_v57 = vsel %vm906_vm4, %v890_v42, %v922_v48 }
 0x13f   : > { %v1100_v53 = vmul.f32 %v2002_v7, %v1082_v50  ;;  %v1326_v54 = vmul.f32 %v2002_v7, %v1308_v51  ;;  %v954_v62 = vmax.f32 %v728_v56, %v938_v57 }
 0x140   : > { %v1405_v55 = vmax.f32 %v1179_v49, %v1389_v52 }
 0x141   : > { %v1116_v58 = vadd.f32 %v2007_v8, %v1100_v53  ;;  %v1342_v59 = vadd.f32 %v2007_v8, %v1326_v54 }
 0x142   : > { %1422 = vst.msk [vmem:[%s2026_s21 + $0x70] sm:$0xff] %vm1407_vm9, %v1405_v55 }
 0x143   : > { %vm1132_vm5 = vcmp.ge.f32.partialorder %v1116_v58, 0.0  ;;  %v1148_v60 = vmul.f32 0.01, %v1116_v58  ;;  %v1374_v61 = vmul.f32 0.01, %v1342_v59  ;;  %vm1358_vm6 = vcmp.ge.f32.partialorder %v1342_v59, 0.0 }
 0x145   : > { %v1164_v63 = vsel %vm1132_vm5, %v1116_v58, %v1148_v60  ;;  %v1390_v1 = vsel %vm1358_vm6, %v1342_v59, %v1374_v61 }
 0x146   : > { %v1180_v0 = vmax.f32 %v954_v62, %v1164_v63 }
 0x148   : > { %v1406_v2 = vmax.f32 %v1180_v0, %v1390_v1 }
 0x14a   : > { %1423 = vst.msk [vmem:[%s2026_s21 + $0x78] sm:$0xff] %vm1407_vm9, %v1406_v2 }
 0x14b PF: > { %p11_p9 = scmp.ge.s32.totalorder %s1839_s19, 6   ;;  %s2191_s15 = smov %s1790_s16 }
 0x14c   : > { %s2192_s16 = smov %s1848_s22  ;;  %s2193_s17 = smov %s1839_s19 }
 0x14d   :  { %13 = sbr.rel (!%p11_p9) target bundleno = 2 (0x2), region = 115 }

</bundles_post_ra>
